<compile_context>
chip_gen: v7x
topology: tpu7x:2x2x1
jax: 0.10.0
libtpu: 0.0.40
codegen_flags: <defaults>
</compile_context>

<pallas_src>
import jax
import jax.numpy as jnp
from jax.experimental import pallas as pl
from jax.experimental.pallas import tpu as pltpu


def _round_up(x, m):
    return ((x + m - 1) // m) * m


# ----------------------------------------------------------------------------
# Pallas kernel: out_tile = diag(scale_tile) @ (adj_tile @ h)    (fused epilogue)
# ----------------------------------------------------------------------------
def _gcn_kernel(adj_ref, h_ref, scale_ref, o_ref):
    # adj_ref:   (tm, K)  bf16  raw 0/1 adjacency row-slab
    # h_ref:     (K, Dp)  f32   source features, already scaled by src inv-sqrt-deg
    # scale_ref: (tm, 1)  f32   dest-side inv-sqrt-degree
    # o_ref:     (tm, Dp) f32
    acc = jnp.dot(
        adj_ref[...].astype(jnp.float32),  # 0/1 -> exact upcast
        h_ref[...],
        preferred_element_type=jnp.float32,
    )
    o_ref[...] = (scale_ref[...] * acc).astype(o_ref.dtype)


def gcn_propagate(adj, h_scaled, scale_out, *, tm=128):
    """out[M, D] = diag(scale_out) @ (adj[M, K] @ h_scaled[K, D])."""
    M, K = adj.shape
    K2, D = h_scaled.shape
    assert K == K2

    # Lane-dense output: pad embed dim to a multiple of 128 (unmasked stores).
    Dp = _round_up(D, 128)
    if Dp != D:
        h_scaled = jnp.pad(h_scaled, ((0, 0), (0, Dp - D)))

    # Pad rows to a whole number of tiles (no divisibility assert, no edge mask).
    tm = min(tm, _round_up(M, 8))
    Mp = _round_up(M, tm)
    if Mp != M:
        adj = jnp.pad(adj, ((0, Mp - M), (0, 0)))
        scale_out = jnp.pad(scale_out, (0, Mp - M))
    scale_col = scale_out.reshape(Mp, 1).astype(jnp.float32)

    out = pl.pallas_call(
        _gcn_kernel,
        out_shape=jax.ShapeDtypeStruct((Mp, Dp), jnp.float32),
        grid_spec=pltpu.PrefetchScalarGridSpec(
            num_scalar_prefetch=0,
            grid=(Mp // tm,),                               # K collapsed: no reduction axis
            in_specs=[
                pl.BlockSpec((tm, K), lambda i: (i, 0)),    # adjacency row-slab (bf16)
                pl.BlockSpec((K, Dp), lambda i: (0, 0)),    # RHS stays VMEM-resident
                pl.BlockSpec((tm, 1), lambda i: (i, 0)),    # dest-side scale
            ],
            out_specs=pl.BlockSpec((tm, Dp), lambda i: (i, 0)),
        ),
        compiler_params=pltpu.CompilerParams(
            dimension_semantics=("parallel",),
        ),
    )(adj, h_scaled, scale_col)
    return out[:M, :D]


# ----------------------------------------------------------------------------
# LightGCN forward (normalization fused; dead non-final layers elided)
# ----------------------------------------------------------------------------
def lightgcn_forward(adj, user_embed, item_embed, num_layers):
    """adj: dense [num_user, num_item] 0/1 bipartite adjacency."""
    assert num_layers >= 1
    # GraphConv norm='both' degree normalization (degrees clamped to >= 1).
    deg_u = jnp.clip(jnp.sum(adj, axis=1), 1.0, None)
    deg_i = jnp.clip(jnp.sum(adj, axis=0), 1.0, None)
    su = jax.lax.rsqrt(deg_u)   # [num_user]
    si = jax.lax.rsqrt(deg_i)   # [num_item]

    # Source-side scaling folded into the tiny feature matrices (not the adjacency).
    h_user = user_embed * su[:, None]
    h_item = item_embed * si[:, None]

    # Raw 0/1 adjacency in bf16 (exact). The transposed copy is stored once,
    # un-normalized, in bf16 -- same total bytes as a single f32 adjacency.
    adj_b = adj.astype(jnp.bfloat16)
    adj_bt = adj_b.T

    # The reference loop discards every non-final layer's output and the final
    # layer applies no ReLU, so exactly one propagation per edge type suffices.
    item_out = gcn_propagate(adj_bt, h_user, si)   # D_i^-1/2 A^T D_u^-1/2 H_user
    user_out = gcn_propagate(adj_b, h_item, su)    # D_u^-1/2 A   D_i^-1/2 H_item
    return {"user": user_out, "item": item_out}


# ----------------------------------------------------------------------------
# Deterministic setup + run
# ----------------------------------------------------------------------------
if __name__ == "__main__":
    num_user = 128
    num_item = 256
    embed_dim = 64
    nhiddens = [64, 64]          # -> 2 weight-free graph-conv layers
    num_layers = len(nhiddens)

    key = jax.random.PRNGKey(0)
    k_adj, k_u, k_i = jax.random.split(key, 3)

    # synthetic bipartite interaction graph (dense 0/1 adjacency)
    adj = jax.random.bernoulli(k_adj, 0.05, (num_user, num_item)).astype(jnp.float32)

    # embedding init: uniform(-0.001, 0.001) as in init_func
    user_embed = jax.random.uniform(
        k_u, (num_user, embed_dim), jnp.float32, minval=-0.001, maxval=0.001
    )
    item_embed = jax.random.uniform(
        k_i, (num_item, embed_dim), jnp.float32, minval=-0.001, maxval=0.001
    )

    fwd = jax.jit(lambda a, u, i: lightgcn_forward(a, u, i, num_layers))
    out = fwd(adj, user_embed, item_embed)
    jax.block_until_ready(out)

    # sanity check against plain-JAX reference
    deg_u = jnp.clip(jnp.sum(adj, axis=1), 1.0, None)
    deg_i = jnp.clip(jnp.sum(adj, axis=0), 1.0, None)
    ref_item = (1.0 / jnp.sqrt(deg_i))[:, None] * (
        adj.T @ ((1.0 / jnp.sqrt(deg_u))[:, None] * user_embed)
    )
    ref_user = (1.0 / jnp.sqrt(deg_u))[:, None] * (
        adj @ ((1.0 / jnp.sqrt(deg_i))[:, None] * item_embed)
    )
    assert out["item"].shape == (num_item, embed_dim)
    assert out["user"].shape == (num_user, embed_dim)
    assert jnp.allclose(out["item"], ref_item, atol=1e-6)
    assert jnp.allclose(out["user"], ref_user, atol=1e-6)

    print("KERNEL_OK")
</pallas_src>

<mosaic_0001>
module attributes {stable_mosaic.version = 11 : i64} {
  func.func @_gcn_kernel(%arg0: i32, %arg1: memref<128x256xbf16, #tpu.memory_space<vmem>>, %arg2: memref<256x128xf32, #tpu.memory_space<vmem>>, %arg3: memref<128x1xf32, #tpu.memory_space<vmem>>, %arg4: memref<128x128xf32, #tpu.memory_space<vmem>>) attributes {dimension_semantics = [#tpu.dimension_semantics<parallel>], iteration_bounds = array<i64: 1>, scalar_prefetch = 0 : i64, scratch_operands = 0 : i64, tpu.core_type = #tpu.core_type<tc>, window_params = [{transform_indices = @transform_0, window_bounds = array<i64: 128, 256>}, {pipeline_mode = #tpu.pipeline_mode<synchronous>, transform_indices = @transform_1, window_bounds = array<i64: 256, 128>}, {transform_indices = @transform_2, window_bounds = array<i64: 128, 1>}, {transform_indices = @transform_3, window_bounds = array<i64: 128, 128>}]} {
    %c0 = arith.constant 0 : index
    %c0_0 = arith.constant 0 : index
    %0 = vector.load %arg1[%c0, %c0_0] : memref<128x256xbf16, #tpu.memory_space<vmem>>, vector<128x256xbf16>
    %1 = arith.extf %0 : vector<128x256xbf16> to vector<128x256xf32>
    %c0_1 = arith.constant 0 : index
    %c0_2 = arith.constant 0 : index
    %2 = vector.load %arg2[%c0_1, %c0_2] : memref<256x128xf32, #tpu.memory_space<vmem>>, vector<256x128xf32>
    %cst = arith.constant dense<0.000000e+00> : vector<128x128xf32>
    %3 = tpu.matmul %1, %2, %cst {dimension_numbers = #tpu.dot_dimension_numbers<[1], [0], [0], [1], [0, 0, 1, 1], [], []>} : vector<128x256xf32>, vector<256x128xf32>, vector<128x128xf32> -> vector<128x128xf32>
    %c0_3 = arith.constant 0 : index
    %c0_4 = arith.constant 0 : index
    %4 = vector.load %arg3[%c0_3, %c0_4] : memref<128x1xf32, #tpu.memory_space<vmem>>, vector<128x1xf32>
    %5 = vector.broadcast %4 : vector<128x1xf32> to vector<128x128xf32>
    %6 = arith.mulf %5, %3 : vector<128x128xf32>
    %c0_5 = arith.constant 0 : index
    %c0_6 = arith.constant 0 : index
    %7 = vector.load %arg4[%c0_5, %c0_6] : memref<128x128xf32, #tpu.memory_space<vmem>>, vector<128x128xf32>
    tpu.vector_store %arg4[%c0_5, %c0_6], %6 {strides = array<i32>} : memref<128x128xf32, #tpu.memory_space<vmem>>, vector<128x128xf32>,
    return
  }
  func.func @transform_0(%arg0: i32) -> (i32, i32) {
    %c0_i32 = arith.constant 0 : i32
    %c0_i32_0 = arith.constant 0 : i32
    return %arg0, %c0_i32 : i32, i32
  }
  func.func @transform_1(%arg0: i32) -> (i32, i32) {
    %c0_i32 = arith.constant 0 : i32
    %c0_i32_0 = arith.constant 0 : i32
    %c0_i32_1 = arith.constant 0 : i32
    return %c0_i32, %c0_i32_0 : i32, i32
  }
  func.func @transform_2(%arg0: i32) -> (i32, i32) {
    %c0_i32 = arith.constant 0 : i32
    %c0_i32_0 = arith.constant 0 : i32
    return %arg0, %c0_i32 : i32, i32
  }
  func.func @transform_3(%arg0: i32) -> (i32, i32) {
    %c0_i32 = arith.constant 0 : i32
    %c0_i32_0 = arith.constant 0 : i32
    return %arg0, %c0_i32 : i32, i32
  }
}

module attributes {stable_mosaic.version = 11 : i64} {
  func.func @_gcn_kernel(%arg0: i32, %arg1: memref<128x128xbf16, #tpu.memory_space<vmem>>, %arg2: memref<128x128xf32, #tpu.memory_space<vmem>>, %arg3: memref<128x1xf32, #tpu.memory_space<vmem>>, %arg4: memref<128x128xf32, #tpu.memory_space<vmem>>) attributes {dimension_semantics = [#tpu.dimension_semantics<parallel>], iteration_bounds = array<i64: 2>, scalar_prefetch = 0 : i64, scratch_operands = 0 : i64, tpu.core_type = #tpu.core_type<tc>, window_params = [{transform_indices = @transform_0, window_bounds = array<i64: 128, 128>}, {pipeline_mode = #tpu.pipeline_mode<synchronous>, transform_indices = @transform_1, window_bounds = array<i64: 128, 128>}, {transform_indices = @transform_2, window_bounds = array<i64: 128, 1>}, {transform_indices = @transform_3, window_bounds = array<i64: 128, 128>}]} {
    %c0 = arith.constant 0 : index
    %c0_0 = arith.constant 0 : index
    %0 = vector.load %arg1[%c0, %c0_0] : memref<128x128xbf16, #tpu.memory_space<vmem>>, vector<128x128xbf16>
    %1 = arith.extf %0 : vector<128x128xbf16> to vector<128x128xf32>
    %c0_1 = arith.constant 0 : index
    %c0_2 = arith.constant 0 : index
    %2 = vector.load %arg2[%c0_1, %c0_2] : memref<128x128xf32, #tpu.memory_space<vmem>>, vector<128x128xf32>
    %cst = arith.constant dense<0.000000e+00> : vector<128x128xf32>
    %3 = tpu.matmul %1, %2, %cst {dimension_numbers = #tpu.dot_dimension_numbers<[1], [0], [0], [1], [0, 0, 1, 1], [], []>} : vector<128x128xf32>, vector<128x128xf32>, vector<128x128xf32> -> vector<128x128xf32>
    %c0_3 = arith.constant 0 : index
    %c0_4 = arith.constant 0 : index
    %4 = vector.load %arg3[%c0_3, %c0_4] : memref<128x1xf32, #tpu.memory_space<vmem>>, vector<128x1xf32>
    %5 = vector.broadcast %4 : vector<128x1xf32> to vector<128x128xf32>
    %6 = arith.mulf %5, %3 : vector<128x128xf32>
    %c0_5 = arith.constant 0 : index
    %c0_6 = arith.constant 0 : index
    %7 = vector.load %arg4[%c0_5, %c0_6] : memref<128x128xf32, #tpu.memory_space<vmem>>, vector<128x128xf32>
    tpu.vector_store %arg4[%c0_5, %c0_6], %6 {strides = array<i32>} : memref<128x128xf32, #tpu.memory_space<vmem>>, vector<128x128xf32>,
    return
  }
  func.func @transform_0(%arg0: i32) -> (i32, i32) {
    %c0_i32 = arith.constant 0 : i32
    %c0_i32_0 = arith.constant 0 : i32
    return %arg0, %c0_i32 : i32, i32
  }
  func.func @transform_1(%arg0: i32) -> (i32, i32) {
    %c0_i32 = arith.constant 0 : i32
    %c0_i32_0 = arith.constant 0 : i32
    %c0_i32_1 = arith.constant 0 : i32
    return %c0_i32, %c0_i32_0 : i32, i32
  }
  func.func @transform_2(%arg0: i32) -> (i32, i32) {
    %c0_i32 = arith.constant 0 : i32
    %c0_i32_0 = arith.constant 0 : i32
    return %arg0, %c0_i32 : i32, i32
  }
  func.func @transform_3(%arg0: i32) -> (i32, i32) {
    %c0_i32 = arith.constant 0 : i32
    %c0_i32_0 = arith.constant 0 : i32
    return %arg0, %c0_i32 : i32, i32
  }
}

</mosaic_0001>

<bundles_post_ra>
// kernel: _lambda_.3
= control target key start
LH: loop header
LB: loop body
LE: loop exit
PB: predicated region body
PF: predicated region fallthrough
CT: control target
= control target key end

     0   :  { %v502_v3 = vmov 0   ;;  %s780_s1 = inlined_call_operand.vmem [shape: f32[256,128], index: 1, kind: input, shape index: {}]   ;;  %s781_s0 = inlined_call_operand.vmem [shape: bf16[128,256], index: 0, kind: input, shape index: {}]   ;;  %s782_s2 = inlined_call_operand.vmem [shape: f32[128,1], index: 2, kind: input, shape index: {}]   ;;  %s783_s3 = inlined_call_operand.vmem [shape: f32[128,128], index: 3, kind: output, shape index: {}]  }
   0x1   :  { %v78_v0 = vld [vmem:[%s780_s1 + $0x80] sm:$0xff]  ;;  %v79_v1 = vld [vmem:[%s780_s1 + $0x88] sm:$0xff]  ;;  %501 = vset.pattern.permute.xlu1 %v502_v3  ;;  %500 = vset.pattern.permute.xlu0 %v502_v3  ;;  %v80_v6 = vld [vmem:[%s780_s1 + $0x90] sm:$0xff] }
   0x2   :  { %v62_v2 = vld [vmem:[%s780_s1] sm:$0xff]  ;;  %v451_v4 = vpack.c.bf16 %v79_v1, %v78_v0  ;;  %v63_v5 = vld [vmem:[%s780_s1 + $0x8] sm:$0xff]  ;;  %v81_v7 = vld [vmem:[%s780_s1 + $0x98] sm:$0xff] }
   0x3   :  { %v453_v8 = vpack.c.bf16 %v63_v5, %v62_v2  ;;  %v455_v9 = vpack.c.bf16 %v81_v7, %v80_v6  ;;  %v64_v10 = vld [vmem:[%s780_s1 + $0x10] sm:$0xff]  ;;  %v65_v11 = vld [vmem:[%s780_s1 + $0x18] sm:$0xff]  ;;  %v82_v12 = vld [vmem:[%s780_s1 + $0xa0] sm:$0xff] }
   0x4   :  { %452 = vmatprep.subr.bf16.mxu0 %v451_v4  ;;  %483 = vmatprep.subr.bf16.mxu1 %v451_v4  ;;  %v83_v13 = vld [vmem:[%s780_s1 + $0xa8] sm:$0xff]  ;;  %v457_v14 = vpack.c.bf16 %v65_v11, %v64_v10  ;;  %v66_v16 = vld [vmem:[%s780_s1 + $0x20] sm:$0xff]  ;;  %v84_v18 = vld [vmem:[%s780_s1 + $0xb0] sm:$0xff] }
   0x5   :  { %454 = vmatpush3.bf16.msra.mxu0 %v453_v8  ;;  %491 = vmatpush3.bf16.msra.mxu1 %v453_v8  ;;  %v459_v15 = vpack.c.bf16 %v83_v13, %v82_v12  ;;  %v67_v17 = vld [vmem:[%s780_s1 + $0x28] sm:$0xff]  ;;  %v85_v19 = vld [vmem:[%s780_s1 + $0xb8] sm:$0xff]  ;;  %v68_v22 = vld [vmem:[%s780_s1 + $0x30] sm:$0xff] }
   0x6   :  { %456 = vmatprep.subr.bf16.mxu0 %v455_v9  ;;  %484 = vmatprep.subr.bf16.mxu1 %v455_v9  ;;  %v461_v20 = vpack.c.bf16 %v67_v17, %v66_v16  ;;  %v463_v21 = vpack.c.bf16 %v85_v19, %v84_v18  ;;  %v69_v23 = vld [vmem:[%s780_s1 + $0x38] sm:$0xff]  ;;  %v86_v24 = vld [vmem:[%s780_s1 + $0xc0] sm:$0xff]  ;;  %v87_v25 = vld [vmem:[%s780_s1 + $0xc8] sm:$0xff] }
   0x7   :  { %v580_v26 = vld [vmem:[%s781_s0] sm:$0xff]  ;;  %v465_v29 = vpack.c.bf16 %v69_v23, %v68_v22  ;;  %v467_v31 = vpack.c.bf16 %v87_v25, %v86_v24  ;;  %v71_v33 = vld [vmem:[%s780_s1 + $0x48] sm:$0xff]  ;;  %v88_v34 = vld [vmem:[%s780_s1 + $0xd0] sm:$0xff] }
   0x8   :  { %v31_v27 = vunpack.c.h.bf16 %v580_v26  ;;  %v586_v28 = vld [vmem:[%s781_s0 + $0x40] sm:$0xff]  ;;  %v89_v35 = vld [vmem:[%s780_s1 + $0xd8] sm:$0xff]  ;;  %v241_v37 = vld [vmem:[%s782_s2 + $0x10] sm:$0xff]  ;;  %v30_v63 = vunpack.c.l.bf16 %v580_v26 }
   0x9   :  { %458 = vmatpush3.bf16.msra.mxu0 %v457_v14  ;;  %492 = vmatpush3.bf16.msra.mxu1 %v457_v14  ;;  %v47_v30 = vunpack.c.h.bf16 %v586_v28  ;;  %v70_v32 = vld [vmem:[%s780_s1 + $0x40] sm:$0xff]  ;;  %v471_v39 = vpack.c.bf16 %v89_v35, %v88_v34  ;;  %v72_v40 = vld [vmem:[%s780_s1 + $0x50] sm:$0xff]  ;;  %v73_v41 = vld [vmem:[%s780_s1 + $0x58] sm:$0xff]  ;;  %v46_v0 = vunpack.c.l.bf16 %v586_v28 }
   0xa   :  { %460 = vmatprep.subr.bf16.mxu0 %v459_v15  ;;  %485 = vmatprep.subr.bf16.mxu1 %v459_v15  ;;  %v469_v36 = vpack.c.bf16 %v71_v33, %v70_v32  ;;  %v239_v38 = vld [vmem:[%s782_s2] sm:$0xff]  ;;  %v91_v43 = vld [vmem:[%s780_s1 + $0xe8] sm:$0xff]  ;;  %v242_v44 = vld [vmem:[%s782_s2 + $0x18] sm:$0xff]  ;;  %v473_v46 = vpack.c.bf16 %v73_v41, %v72_v40 }
   0xb   :  { %158 = vmatprep.mubr.f32.mxu0 %v31_v27  ;;  %198 = vmatprep.mubr.f32.mxu1 %v47_v30  ;;  %v90_v42 = vld [vmem:[%s780_s1 + $0xe0] sm:$0xff]  ;;  %v240_v45 = vld [vmem:[%s782_s2 + $0x8] sm:$0xff]  ;;  %v92_v50 = vld [vmem:[%s780_s1 + $0xf0] sm:$0xff] }
   0xc   :  { %267 = vperm.xlu1 %501, %v241_v37   ;;  %257 = vperm.xlu0 %500, %v239_v38   ;;  %v475_v47 = vpack.c.bf16 %v91_v43, %v90_v42  ;;  %v74_v48 = vld [vmem:[%s780_s1 + $0x60] sm:$0xff]  ;;  %v75_v49 = vld [vmem:[%s780_s1 + $0x68] sm:$0xff]  ;;  %v93_v51 = vld [vmem:[%s780_s1 + $0xf8] sm:$0xff] }
   0xd   :  { %462 = vmatpush3.bf16.msra.mxu0 %v461_v20  ;;  %493 = vmatpush3.bf16.msra.mxu1 %v461_v20  ;;  %v244_v52 = vld [vmem:[%s782_s2 + $0x28] sm:$0xff]  ;;  %v243_v53 = vld [vmem:[%s782_s2 + $0x20] sm:$0xff]  ;;  %v477_v54 = vpack.c.bf16 %v75_v49, %v74_v48  ;;  %v479_v55 = vpack.c.bf16 %v93_v51, %v92_v50  ;;  %v76_v56 = vld [vmem:[%s780_s1 + $0x70] sm:$0xff] }
   0xe   :  { %464 = vmatprep.subr.bf16.mxu0 %v463_v21  ;;  %486 = vmatprep.subr.bf16.mxu1 %v463_v21  ;;  %v77_v57 = vld [vmem:[%s780_s1 + $0x78] sm:$0xff]  ;;  %v245_v59 = vld [vmem:[%s782_s2 + $0x30] sm:$0xff]  ;;  %v15_v61 = vld [vmem:[%s781_s0 + $0x8] sm:$0xff] }
   0xf   :  { %v246_v58 = vld [vmem:[%s782_s2 + $0x38] sm:$0xff]  ;;  %v481_v60 = vpack.c.bf16 %v77_v57, %v76_v56  ;;  %v23_v62 = vld [vmem:[%s781_s0 + $0x48] sm:$0xff]  ;;  %v247_v2 = vld [vmem:[%s782_s2 + $0x40] sm:$0xff]  ;;  %v33_v3 = vunpack.c.h.bf16 %v15_v61  ;;  %v32_v7 = vunpack.c.l.bf16 %v15_v61 }
  0x10   :  { %272 = vperm.xlu1 %501, %v242_v44   ;;  %262 = vperm.xlu0 %500, %v240_v45   ;;  %v248_v1 = vld [vmem:[%s782_s2 + $0x48] sm:$0xff]  ;;  %v49_v4 = vunpack.c.h.bf16 %v23_v62  ;;  %v16_v5 = vld [vmem:[%s781_s0 + $0x10] sm:$0xff]  ;;  %v48_v8 = vunpack.c.l.bf16 %v23_v62  ;;  %v250_v9 = vld [vmem:[%s782_s2 + $0x58] sm:$0xff] }
  0x11   :  { %466 = vmatpush3.bf16.msra.mxu0 %v465_v29  ;;  %494 = vmatpush3.bf16.msra.mxu1 %v465_v29  ;;  %v24_v6 = vld [vmem:[%s781_s0 + $0x50] sm:$0xff]  ;;  %v35_v11 = vunpack.c.h.bf16 %v16_v5  ;;  %v17_v13 = vld [vmem:[%s781_s0 + $0x18] sm:$0xff]  ;;  %v34_v15 = vunpack.c.l.bf16 %v16_v5  ;;  %v252_v17 = vld [vmem:[%s782_s2 + $0x68] sm:$0xff] }
  0x12   :  { %468 = vmatprep.subr.bf16.mxu0 %v467_v31  ;;  %487 = vmatprep.subr.bf16.mxu1 %v467_v31  ;;  %v249_v10 = vld [vmem:[%s782_s2 + $0x50] sm:$0xff]  ;;  %v51_v12 = vunpack.c.h.bf16 %v24_v6  ;;  %v25_v14 = vld [vmem:[%s781_s0 + $0x58] sm:$0xff]  ;;  %v50_v16 = vunpack.c.l.bf16 %v24_v6  ;;  %v251_v18 = vld [vmem:[%s782_s2 + $0x60] sm:$0xff]  ;;  %v37_v19 = vunpack.c.h.bf16 %v17_v13  ;;  %v36_v23 = vunpack.c.l.bf16 %v17_v13 }
  0x13   :  { %v53_v20 = vunpack.c.h.bf16 %v25_v14  ;;  %v18_v21 = vld [vmem:[%s781_s0 + $0x20] sm:$0xff]  ;;  %v52_v24 = vunpack.c.l.bf16 %v25_v14  ;;  %v254_v25 = vld [vmem:[%s782_s2 + $0x78] sm:$0xff]  ;;  %v253_v26 = vld [vmem:[%s782_s2 + $0x70] sm:$0xff] }
  0x14   :  { %282 = vperm.xlu1 %501, %v244_v52   ;;  %277 = vperm.xlu0 %500, %v243_v53   ;;  %v26_v22 = vld [vmem:[%s781_s0 + $0x60] sm:$0xff]  ;;  %v39_v27 = vunpack.c.h.bf16 %v18_v21  ;;  %v19_v29 = vld [vmem:[%s781_s0 + $0x28] sm:$0xff]  ;;  %v38_v31 = vunpack.c.l.bf16 %v18_v21  ;;  %v20_v35 = vld [vmem:[%s781_s0 + $0x30] sm:$0xff] }
  0x15   :  { %470 = vmatpush3.bf16.msra.mxu0 %v469_v36  ;;  %495 = vmatpush3.bf16.msra.mxu1 %v469_v36  ;;  %v55_v28 = vunpack.c.h.bf16 %v26_v22  ;;  %v27_v30 = vld [vmem:[%s781_s0 + $0x68] sm:$0xff]  ;;  %v54_v32 = vunpack.c.l.bf16 %v26_v22  ;;  %v41_v33 = vunpack.c.h.bf16 %v19_v29  ;;  %v28_v36 = vld [vmem:[%s781_s0 + $0x70] sm:$0xff]  ;;  %v40_v37 = vunpack.c.l.bf16 %v19_v29  ;;  %v21_v41 = vld [vmem:[%s781_s0 + $0x38] sm:$0xff] }
  0x16   :  { %472 = vmatprep.subr.bf16.mxu0 %v471_v39  ;;  %488 = vmatprep.subr.bf16.mxu1 %v471_v39  ;;  %v57_v34 = vunpack.c.h.bf16 %v27_v30  ;;  %v56_v38 = vunpack.c.l.bf16 %v27_v30  ;;  %v43_v39 = vunpack.c.h.bf16 %v20_v35  ;;  %v59_v40 = vunpack.c.h.bf16 %v28_v36  ;;  %v29_v42 = vld [vmem:[%s781_s0 + $0x78] sm:$0xff] }
  0x17   :  { %v42_v43 = vunpack.c.l.bf16 %v20_v35  ;;  %v58_v44 = vunpack.c.l.bf16 %v28_v36  ;;  %v45_v45 = vunpack.c.h.bf16 %v21_v41  ;;  %v60_v48 = vunpack.c.l.bf16 %v29_v42 }
  0x18   :  { %292 = vperm.xlu1 %501, %v246_v58   ;;  %287 = vperm.xlu0 %500, %v245_v59  }
  0x19   :  { %474 = vmatpush3.bf16.msra.mxu0 %v473_v46  ;;  %496 = vmatpush3.bf16.msra.mxu1 %v473_v46  ;;  %v61_v46 = vunpack.c.h.bf16 %v29_v42 }
  0x1a   :  { %476 = vmatprep.subr.bf16.mxu0 %v475_v47  ;;  %489 = vmatprep.subr.bf16.mxu1 %v475_v47  ;;  %v44_v47 = vunpack.c.l.bf16 %v21_v41 }
  0x1c   :  { %302 = vperm.xlu1 %501, %v248_v1   ;;  %297 = vperm.xlu0 %500, %v247_v2  }
  0x1d   :  { %478 = vmatpush3.bf16.msra.mxu0 %v477_v54  ;;  %497 = vmatpush3.bf16.msra.mxu1 %v477_v54 }
  0x1e   :  { %480 = vmatprep.subr.bf16.mxu0 %v479_v55  ;;  %490 = vmatprep.subr.bf16.mxu1 %v479_v55 }
  0x20   :  { %312 = vperm.xlu1 %501, %v250_v9   ;;  %307 = vperm.xlu0 %500, %v249_v10  }
  0x21   :  { %482 = vmatpush3.bf16.msra.mxu0 %v481_v60  ;;  %498 = vmatpush3.bf16.msra.mxu1 %v481_v60 }
  0x24   :  { %159 = vmatmul.mubr.f32.vlgmr.msra.gmra.mrb[0].mxu0 %v30_v63  ;;  %199 = vmatmul.mubr.f32.vlgmr.msra.gmra.mrb[0].mxu1 %v46_v0 }
  0x25   :  { %163 = vmatprep.mubr.f32.mxu0 %v33_v3  ;;  %203 = vmatprep.mubr.f32.mxu1 %v49_v4 }
  0x26   :  { %322 = vperm.xlu1 %501, %v252_v17   ;;  %317 = vperm.xlu0 %500, %v251_v18  }
  0x28   :  { %164 = vmatmul.mubr.f32.gmra.mrb[2].mxu0 %v32_v7  ;;  %204 = vmatmul.mubr.f32.gmra.mrb[2].mxu1 %v48_v8 }
  0x29   :  { %168 = vmatprep.mubr.f32.mxu0 %v35_v11  ;;  %208 = vmatprep.mubr.f32.mxu1 %v51_v12 }
  0x2a   :  { %332 = vperm.xlu1 %501, %v254_v25   ;;  %327 = vperm.xlu0 %500, %v253_v26  }
  0x2c   :  { %169 = vmatmul.mubr.f32.gmra.mrb[4].mxu0 %v34_v15  ;;  %209 = vmatmul.mubr.f32.gmra.mrb[4].mxu1 %v50_v16 }
  0x2d   :  { %173 = vmatprep.mubr.f32.mxu0 %v37_v19  ;;  %213 = vmatprep.mubr.f32.mxu1 %v53_v20 }
  0x30   :  { %174 = vmatmul.mubr.f32.gmra.mrb[6].mxu0 %v36_v23  ;;  %214 = vmatmul.mubr.f32.gmra.mrb[6].mxu1 %v52_v24 }
  0x31   :  { %178 = vmatprep.mubr.f32.mxu0 %v39_v27  ;;  %218 = vmatprep.mubr.f32.mxu1 %v55_v28 }
  0x34   :  { %179 = vmatmul.mubr.f32.gmra.mrb[8].mxu0 %v38_v31  ;;  %219 = vmatmul.mubr.f32.gmra.mrb[8].mxu1 %v54_v32 }
  0x35   :  { %183 = vmatprep.mubr.f32.mxu0 %v41_v33  ;;  %223 = vmatprep.mubr.f32.mxu1 %v57_v34 }
  0x38   :  { %184 = vmatmul.mubr.f32.gmra.mrb[10].mxu0 %v40_v37  ;;  %224 = vmatmul.mubr.f32.gmra.mrb[10].mxu1 %v56_v38 }
  0x39   :  { %188 = vmatprep.mubr.f32.mxu0 %v43_v39  ;;  %228 = vmatprep.mubr.f32.mxu1 %v59_v40 }
  0x3c   :  { %189 = vmatmul.mubr.f32.gmra.mrb[12].mxu0 %v42_v43  ;;  %229 = vmatmul.mubr.f32.gmra.mrb[12].mxu1 %v58_v44 }
  0x3d   :  { %193 = vmatprep.mubr.f32.mxu0 %v45_v45  ;;  %233 = vmatprep.mubr.f32.mxu1 %v61_v46 }
  0x40   :  { %194 = vmatmul.mubr.f32.gmra.mrb[14].mxu0 %v44_v47  ;;  %234 = vmatmul.mubr.f32.gmra.mrb[14].mxu1 %v60_v48 }
  0x8b   :  { %v258_v49 = vpop.permute.xlu0 %257  ;;  %v268_v50 = vpop.permute.xlu1 %267 }
  0x8f   :  { %v263_v51 = vpop.permute.xlu0 %262  ;;  %v273_v52 = vpop.permute.xlu1 %272 }
  0x93   :  { %v278_v53 = vpop.permute.xlu0 %277  ;;  %v723_v54 = vpop.permute.xlu1 %282 }
  0x97   :  { %v725_v55 = vpop.permute.xlu0 %287  ;;  %v727_v56 = vpop.permute.xlu1 %292 }
  0x9b   :  { %v298_v63 = vpop.permute.xlu0 %297  ;;  %v303_v8 = vpop.permute.xlu1 %302 }
  0x9f   :  { %v308_v17 = vpop.permute.xlu0 %307  ;;  %v313_v26 = vpop.permute.xlu1 %312 }
  0xa5   :  { %v318_v35 = vpop.permute.xlu0 %317  ;;  %v323_v44 = vpop.permute.xlu1 %322 }
  0xf7   :  { %v403_v57 = vpop.f32.mrb[0].mxu0  ;;  %v427_v58 = vpop.f32.mrb[0].mxu1 }
  0xf8   :  { %v404_v59 = vpop.f32.mrb[1].mxu0  ;;  %v428_v60 = vpop.f32.mrb[1].mxu1 }
  0xf9   :  { %v405_v61 = vadd.f32 %v404_v59, %v403_v57  ;;  %v429_v62 = vadd.f32 %v428_v60, %v427_v58 }
  0xfb   :  { %v335_v0 = vmul.f32 %v405_v61, %v258_v49  ;;  %v343_v1 = vmul.f32 %v429_v62, %v298_v63  ;;  %v406_v2 = vpop.f32.mrb[2].mxu0  ;;  %v430_v3 = vpop.f32.mrb[2].mxu1 }
  0xfc   :  { %v407_v4 = vpop.f32.mrb[3].mxu0  ;;  %v431_v5 = vpop.f32.mrb[3].mxu1 }
  0xfd   :  { %351 = vst [vmem:[%s783_s3] sm:$0xff] %v335_v0  ;;  %359 = vst [vmem:[%s783_s3 + $0x40] sm:$0xff] %v343_v1  ;;  %v408_v6 = vadd.f32 %v407_v4, %v406_v2  ;;  %v432_v7 = vadd.f32 %v431_v5, %v430_v3  ;;  %v333_v0 = vpop.permute.xlu1 %332 }
  0xff   :  { %v336_v9 = vmul.f32 %v408_v6, %v263_v51  ;;  %v344_v10 = vmul.f32 %v432_v7, %v303_v8  ;;  %v409_v11 = vpop.f32.mrb[4].mxu0  ;;  %v433_v12 = vpop.f32.mrb[4].mxu1 }
 0x100   :  { %v410_v13 = vpop.f32.mrb[5].mxu0  ;;  %v434_v14 = vpop.f32.mrb[5].mxu1 }
 0x101   :  { %352 = vst [vmem:[%s783_s3 + $0x8] sm:$0xff] %v336_v9  ;;  %360 = vst [vmem:[%s783_s3 + $0x48] sm:$0xff] %v344_v10  ;;  %v411_v15 = vadd.f32 %v410_v13, %v409_v11  ;;  %v435_v16 = vadd.f32 %v434_v14, %v433_v12 }
 0x103   :  { %v337_v18 = vmul.f32 %v411_v15, %v268_v50  ;;  %v345_v19 = vmul.f32 %v435_v16, %v308_v17  ;;  %v412_v20 = vpop.f32.mrb[6].mxu0  ;;  %v436_v21 = vpop.f32.mrb[6].mxu1 }
 0x104   :  { %v413_v22 = vpop.f32.mrb[7].mxu0  ;;  %v437_v23 = vpop.f32.mrb[7].mxu1 }
 0x105   :  { %353 = vst [vmem:[%s783_s3 + $0x10] sm:$0xff] %v337_v18  ;;  %361 = vst [vmem:[%s783_s3 + $0x50] sm:$0xff] %v345_v19  ;;  %v414_v24 = vadd.f32 %v413_v22, %v412_v20  ;;  %v438_v25 = vadd.f32 %v437_v23, %v436_v21 }
 0x107   :  { %v338_v27 = vmul.f32 %v414_v24, %v273_v52  ;;  %v346_v28 = vmul.f32 %v438_v25, %v313_v26  ;;  %v415_v29 = vpop.f32.mrb[8].mxu0  ;;  %v439_v30 = vpop.f32.mrb[8].mxu1 }
 0x108   :  { %v416_v31 = vpop.f32.mrb[9].mxu0  ;;  %v440_v32 = vpop.f32.mrb[9].mxu1 }
 0x109   :  { %354 = vst [vmem:[%s783_s3 + $0x18] sm:$0xff] %v338_v27  ;;  %362 = vst [vmem:[%s783_s3 + $0x58] sm:$0xff] %v346_v28  ;;  %v417_v33 = vadd.f32 %v416_v31, %v415_v29  ;;  %v441_v34 = vadd.f32 %v440_v32, %v439_v30 }
 0x10b   :  { %v339_v36 = vmul.f32 %v417_v33, %v278_v53  ;;  %v347_v37 = vmul.f32 %v441_v34, %v318_v35  ;;  %v418_v38 = vpop.f32.mrb[10].mxu0  ;;  %v442_v39 = vpop.f32.mrb[10].mxu1 }
 0x10c   :  { %v419_v40 = vpop.f32.mrb[11].mxu0  ;;  %v443_v41 = vpop.f32.mrb[11].mxu1 }
 0x10d   :  { %355 = vst [vmem:[%s783_s3 + $0x20] sm:$0xff] %v339_v36  ;;  %363 = vst [vmem:[%s783_s3 + $0x60] sm:$0xff] %v347_v37  ;;  %v420_v42 = vadd.f32 %v419_v40, %v418_v38  ;;  %v444_v43 = vadd.f32 %v443_v41, %v442_v39  ;;  %v328_v53 = vpop.permute.xlu0 %327 }
 0x10f   :  { %v340_v45 = vmul.f32 %v420_v42, %v723_v54  ;;  %v348_v46 = vmul.f32 %v444_v43, %v323_v44  ;;  %v421_v47 = vpop.f32.mrb[12].mxu0  ;;  %v445_v48 = vpop.f32.mrb[12].mxu1 }
 0x110   :  { %v422_v49 = vpop.f32.mrb[13].mxu0  ;;  %v446_v50 = vpop.f32.mrb[13].mxu1 }
 0x111   :  { %356 = vst [vmem:[%s783_s3 + $0x28] sm:$0xff] %v340_v45  ;;  %364 = vst [vmem:[%s783_s3 + $0x68] sm:$0xff] %v348_v46  ;;  %v423_v51 = vadd.f32 %v422_v49, %v421_v47  ;;  %v447_v52 = vadd.f32 %v446_v50, %v445_v48 }
 0x113   :  { %v341_v57 = vmul.f32 %v423_v51, %v725_v55  ;;  %v349_v58 = vmul.f32 %v447_v52, %v328_v53  ;;  %v424_v54 = vpop.f32.mrb[14].mxu0  ;;  %v448_v59 = vpop.f32.mrb[14].mxu1 }
 0x114   :  { %v425_v60 = vpop.f32.mrb[15].mxu0  ;;  %v449_v61 = vpop.f32.mrb[15].mxu1 }
 0x115   :  { %357 = vst [vmem:[%s783_s3 + $0x30] sm:$0xff] %v341_v57  ;;  %365 = vst [vmem:[%s783_s3 + $0x70] sm:$0xff] %v349_v58  ;;  %v426_v62 = vadd.f32 %v425_v60, %v424_v54  ;;  %v450_v63 = vadd.f32 %v449_v61, %v448_v59 }
 0x117   :  { %v342_v1 = vmul.f32 %v426_v62, %v727_v56  ;;  %v350_v2 = vmul.f32 %v450_v63, %v333_v0 }
 0x119   :  { %358 = vst [vmem:[%s783_s3 + $0x38] sm:$0xff] %v342_v1  ;;  %366 = vst [vmem:[%s783_s3 + $0x78] sm:$0xff] %v350_v2 }

// kernel: _lambda_.2
= control target key start
LH: loop header
LB: loop body
LE: loop exit
PB: predicated region body
PF: predicated region fallthrough
CT: control target
= control target key end

     0   :  { %s813_s12 = smov 0   ;;  %s943_s0 = inlined_call_operand.vmem [shape: bf16[256,128], index: 0, kind: input, shape index: {}]   ;;  %s944_s1 = inlined_call_operand.vmem [shape: f32[128,128], index: 1, kind: input, shape index: {}]   ;;  %s945_s2 = inlined_call_operand.vmem [shape: f32[256,1], index: 2, kind: input, shape index: {}]   ;;  %s946_s3 = inlined_call_operand.vmem [shape: f32[256,128], index: 3, kind: output, shape index: {}]  }
   0x1 LB: > { %s585_s13 = sadd.s32 4294967295, %s790_s12   ;;  %p589_p0 = scmp.ge.s32.totalorder %s790_s12, 1  ;;  %s790_s12 = sphi %s813_s12, %s13_s12  }
   0x2   : > { %p149_p1 = scmp.lt.s32.totalorder %s790_s12, 3 }
   0x4   : > { %p150_p2 = pnand %p589_p0, %p149_p1 }
   0x5   : > { %v228_v0 = vld [vmem:[%s944_s1] sm:$0xff] (!%p150_p2)  ;;  %v229_v1 = vld [vmem:[%s944_s1 + $0x8] sm:$0xff] (!%p150_p2)  ;;  %v230_v2 = vld [vmem:[%s944_s1 + $0x10] sm:$0xff] (!%p150_p2)  ;;  %s590_s20 = sshll.u32 (!%p150_p2), %s585_s13, 4  ;;  %v792_v5 = vmov (!%p150_p2), 0  }
   0x6   : > { %153 = sbr.rel (%p150_p2) target bundleno = 269 (0x10d), region = 32  ;;  %v725_v3 = vpack.c.bf16 (!%p150_p2), %v229_v1, %v228_v0  ;;  %v231_v4 = vld [vmem:[%s944_s1 + $0x18] sm:$0xff] (!%p150_p2)  ;;  %p179_p3 = scmp.lt.s32.totalorder (!%p150_p2), %s590_s20, 31  ;;  %783 = vset.pattern.permute.xlu1 (!%p150_p2), %v792_v5  ;;  %782 = vset.pattern.permute.xlu0 (!%p150_p2), %v792_v5  ;;  %v232_v7 = vld [vmem:[%s944_s1 + $0x20] sm:$0xff] (!%p150_p2)  ;;  %v233_v8 = vld [vmem:[%s944_s1 + $0x28] sm:$0xff] (!%p150_p2) }
   0x7   : > { %v729_v6 = vpack.c.bf16 (!%p150_p2), %v231_v4, %v230_v2  ;;  %v733_v9 = vpack.c.bf16 (!%p150_p2), %v233_v8, %v232_v7  ;;  %v234_v10 = vld [vmem:[%s944_s1 + $0x30] sm:$0xff] (!%p150_p2)  ;;  %v235_v11 = vld [vmem:[%s944_s1 + $0x38] sm:$0xff] (!%p150_p2)  ;;  %v236_v18 = vld [vmem:[%s944_s1 + $0x40] sm:$0xff] (!%p150_p2) }
   0x8   : > { %726 = vmatprep.subr.bf16.mxu0 (!%p150_p2), %v725_v3  ;;  %757 = vmatprep.subr.bf16.mxu1 (!%p150_p2), %v725_v3  ;;  %v737_v16 = vpack.c.bf16 (!%p150_p2), %v235_v11, %v234_v10  ;;  %v237_v19 = vld [vmem:[%s944_s1 + $0x48] sm:$0xff] (!%p150_p2)  ;;  %v238_v24 = vld [vmem:[%s944_s1 + $0x50] sm:$0xff] (!%p150_p2)  ;;  %v239_v25 = vld [vmem:[%s944_s1 + $0x58] sm:$0xff] (!%p150_p2) }
   0x9   : > { %728 = vmatpush3.bf16.msra.mxu0 (!%p150_p2), %v725_v3  ;;  %765 = vmatpush3.bf16.msra.mxu1 (!%p150_p2), %v725_v3  ;;  %v741_v23 = vpack.c.bf16 (!%p150_p2), %v237_v19, %v236_v18  ;;  %v745_v28 = vpack.c.bf16 (!%p150_p2), %v239_v25, %v238_v24  ;;  %v240_v29 = vld [vmem:[%s944_s1 + $0x60] sm:$0xff] (!%p150_p2)  ;;  %v241_v30 = vld [vmem:[%s944_s1 + $0x68] sm:$0xff] (!%p150_p2)  ;;  %v242_v34 = vld [vmem:[%s944_s1 + $0x70] sm:$0xff] (!%p150_p2) }
   0xa   : > { %730 = vmatprep.subr.bf16.mxu0 (!%p150_p2), %v729_v6  ;;  %758 = vmatprep.subr.bf16.mxu1 (!%p150_p2), %v729_v6  ;;  %v749_v33 = vpack.c.bf16 (!%p150_p2), %v241_v30, %v240_v29  ;;  %v243_v35 = vld [vmem:[%s944_s1 + $0x78] sm:$0xff] (!%p150_p2) }
   0xb   : > { %v753_v38 = vpack.c.bf16 (!%p150_p2), %v243_v35, %v242_v34 }
   0xd   : > { %s948_s20 = smov (!%p179_p3, %s590_s20), 31  ;;  %732 = vmatpush3.bf16.msra.mxu0 %v729_v6  ;;  %766 = vmatpush3.bf16.msra.mxu1 %v729_v6 }
   0xe   : > { %s591_s27 = sshll.u32 %s948_s20, 2  ;;  %s593_s28 = sshll.u32 %s948_s20, 3  ;;  %734 = vmatprep.subr.bf16.mxu0 %v733_v9  ;;  %759 = vmatprep.subr.bf16.mxu1 %v733_v9 }
   0xf   : > { %s852_s8 = scalar_lea.vmem %s943_s0, %s591_s27  ;;  %s859_s11 = scalar_lea.vmem %s945_s2, %s593_s28 }
  0x10   : > { %v862_v12 = vld [vmem:[%s852_s8] sm:$0xff]   ;;  %v391_v17 = vld [vmem:[%s859_s11 + $0x10] sm:$0xff]  ;;  %v392_v21 = vld [vmem:[%s859_s11 + $0x18] sm:$0xff]  ;;  %s922_s6 = scalar_lea.vmem %s946_s3, %s593_s28 }
  0x11   : > { %v865_v13 = vld [vmem:[%s852_s8 + $0x20] sm:$0xff]   ;;  %v600_v14 = vunpack.c.l.bf16 %v862_v12  ;;  %417 = vperm.xlu1 %783, %v391_v17   ;;  %736 = vmatpush3.bf16.msra.mxu0 %v733_v9  ;;  %v390_v22 = vld [vmem:[%s859_s11 + $0x8] sm:$0xff]  ;;  %v396_v31 = vld [vmem:[%s859_s11 + $0x38] sm:$0xff]  ;;  %v601_v43 = vunpack.c.h.bf16 %v862_v12 }
  0x12   : > { %v616_v15 = vunpack.c.l.bf16 %v865_v13  ;;  %v389_v20 = vld [vmem:[%s859_s11] sm:$0xff]  ;;  %767 = vmatpush3.bf16.msra.mxu1 %v733_v9  ;;  %738 = vmatprep.subr.bf16.mxu0 %v737_v16  ;;  %v394_v26 = vld [vmem:[%s859_s11 + $0x28] sm:$0xff]  ;;  %v395_v32 = vld [vmem:[%s859_s11 + $0x30] sm:$0xff]  ;;  %v617_v44 = vunpack.c.h.bf16 %v865_v13 }
  0x13   : > { %701 = vmatprep.mubr.f32.mxu0 %v600_v14  ;;  %407 = vperm.xlu0 %782, %v389_v20   ;;  %v393_v27 = vld [vmem:[%s859_s11 + $0x20] sm:$0xff]  ;;  %v398_v36 = vld [vmem:[%s859_s11 + $0x48] sm:$0xff]  ;;  %v400_v39 = vld [vmem:[%s859_s11 + $0x58] sm:$0xff] }
  0x14   : > { %713 = vmatprep.mubr.f32.mxu1 %v616_v15  ;;  %760 = vmatprep.subr.bf16.mxu1 %v737_v16  ;;  %v397_v37 = vld [vmem:[%s859_s11 + $0x40] sm:$0xff]  ;;  %v399_v40 = vld [vmem:[%s859_s11 + $0x50] sm:$0xff]  ;;  %v630_v41 = vld [vmem:[%s852_s8 + $0x8] sm:$0xff]  }
  0x15   : > { %422 = vperm.xlu1 %783, %v392_v21   ;;  %740 = vmatpush3.bf16.msra.mxu0 %v737_v16  ;;  %v634_v42 = vld [vmem:[%s852_s8 + $0x28] sm:$0xff]   ;;  %v604_v45 = vunpack.c.l.bf16 %v630_v41  ;;  %v631_v47 = vld [vmem:[%s852_s8 + $0x10] sm:$0xff]   ;;  %v401_v50 = vld [vmem:[%s859_s11 + $0x60] sm:$0xff]  ;;  %v605_v51 = vunpack.c.h.bf16 %v630_v41 }
  0x16   : > { %768 = vmatpush3.bf16.msra.mxu1 %v737_v16  ;;  %742 = vmatprep.subr.bf16.mxu0 %v741_v23  ;;  %v620_v46 = vunpack.c.l.bf16 %v634_v42  ;;  %v635_v48 = vld [vmem:[%s852_s8 + $0x30] sm:$0xff]   ;;  %v402_v49 = vld [vmem:[%s859_s11 + $0x68] sm:$0xff]  ;;  %v621_v52 = vunpack.c.h.bf16 %v634_v42  ;;  %v608_v53 = vunpack.c.l.bf16 %v631_v47  ;;  %v632_v55 = vld [vmem:[%s852_s8 + $0x18] sm:$0xff]   ;;  %v609_v59 = vunpack.c.h.bf16 %v631_v47 }
  0x17   : > { %412 = vperm.xlu0 %782, %v390_v22   ;;  %761 = vmatprep.subr.bf16.mxu1 %v741_v23  ;;  %v624_v54 = vunpack.c.l.bf16 %v635_v48  ;;  %v636_v56 = vld [vmem:[%s852_s8 + $0x38] sm:$0xff]   ;;  %v403_v58 = vld [vmem:[%s859_s11 + $0x70] sm:$0xff]  ;;  %v625_v60 = vunpack.c.h.bf16 %v635_v48  ;;  %v612_v61 = vunpack.c.l.bf16 %v632_v55  ;;  %v613_v63 = vunpack.c.h.bf16 %v632_v55 }
  0x18   : > { %v404_v57 = vld [vmem:[%s859_s11 + $0x78] sm:$0xff]  ;;  %v628_v62 = vunpack.c.l.bf16 %v636_v56  ;;  %v629_v0 = vunpack.c.h.bf16 %v636_v56 }
  0x19   : > { %432 = vperm.xlu1 %783, %v394_v26   ;;  %744 = vmatpush3.bf16.msra.mxu0 %v741_v23 }
  0x1a   : > { %769 = vmatpush3.bf16.msra.mxu1 %v741_v23  ;;  %746 = vmatprep.subr.bf16.mxu0 %v745_v28 }
  0x1b   : > { %427 = vperm.xlu0 %782, %v393_v27   ;;  %762 = vmatprep.subr.bf16.mxu1 %v745_v28 }
  0x1d   : > { %442 = vperm.xlu1 %783, %v396_v31   ;;  %748 = vmatpush3.bf16.msra.mxu0 %v745_v28 }
  0x1e   : > { %770 = vmatpush3.bf16.msra.mxu1 %v745_v28  ;;  %750 = vmatprep.subr.bf16.mxu0 %v749_v33 }
  0x1f   : > { %437 = vperm.xlu0 %782, %v395_v32   ;;  %763 = vmatprep.subr.bf16.mxu1 %v749_v33 }
  0x21   : > { %452 = vperm.xlu1 %783, %v398_v36   ;;  %752 = vmatpush3.bf16.msra.mxu0 %v749_v33 }
  0x22   : > { %771 = vmatpush3.bf16.msra.mxu1 %v749_v33  ;;  %754 = vmatprep.subr.bf16.mxu0 %v753_v38 }
  0x23   : > { %447 = vperm.xlu0 %782, %v397_v37   ;;  %764 = vmatprep.subr.bf16.mxu1 %v753_v38 }
  0x25   : > { %462 = vperm.xlu1 %783, %v400_v39   ;;  %756 = vmatpush3.bf16.msra.mxu0 %v753_v38 }
  0x26   : > { %772 = vmatpush3.bf16.msra.mxu1 %v753_v38 }
  0x27   : > { %457 = vperm.xlu0 %782, %v399_v40  }
  0x28   : > { %702 = vmatmul.mubr.f32.vlgmr.msra.gmra.mrb[0].mxu0 %v601_v43 }
  0x29   : > { %714 = vmatmul.mubr.f32.vlgmr.msra.gmra.mrb[0].mxu1 %v617_v44  ;;  %704 = vmatprep.mubr.f32.mxu0 %v604_v45 }
  0x2a   : > { %716 = vmatprep.mubr.f32.mxu1 %v620_v46  ;;  %472 = vperm.xlu1 %783, %v402_v49  }
  0x2b   : > { %467 = vperm.xlu0 %782, %v401_v50  }
  0x2c   : > { %705 = vmatmul.mubr.f32.gmra.mrb[2].mxu0 %v605_v51 }
  0x2d   : > { %717 = vmatmul.mubr.f32.gmra.mrb[2].mxu1 %v621_v52  ;;  %707 = vmatprep.mubr.f32.mxu0 %v608_v53 }
  0x2e   : > { %719 = vmatprep.mubr.f32.mxu1 %v624_v54  ;;  %482 = vperm.xlu1 %783, %v404_v57  }
  0x2f   : > { %477 = vperm.xlu0 %782, %v403_v58  }
  0x30   : > { %708 = vmatmul.mubr.f32.gmra.mrb[4].mxu0 %v609_v59 }
  0x31   : > { %720 = vmatmul.mubr.f32.gmra.mrb[4].mxu1 %v625_v60  ;;  %710 = vmatprep.mubr.f32.mxu0 %v612_v61 }
  0x32   : > { %722 = vmatprep.mubr.f32.mxu1 %v628_v62 }
  0x34   : > { %711 = vmatmul.mubr.f32.gmra.mrb[6].mxu0 %v613_v63 }
  0x35   : > { %723 = vmatmul.mubr.f32.gmra.mrb[6].mxu1 %v629_v0 }
  0x90   : > { %v418_v1 = vpop.permute.xlu1 %417 }
  0x92   : > { %v408_v2 = vpop.permute.xlu0 %407 }
  0x94   : > { %v423_v3 = vpop.permute.xlu1 %422 }
  0x96   : > { %v413_v4 = vpop.permute.xlu0 %412 }
  0x98   : > { %v433_v5 = vpop.permute.xlu1 %432 }
  0x9a   : > { %v428_v6 = vpop.permute.xlu0 %427 }
  0x9c   : > { %v443_v7 = vpop.permute.xlu1 %442 }
  0x9e   : > { %v438_v8 = vpop.permute.xlu0 %437 }
  0xa0   : > { %v453_v9 = vpop.permute.xlu1 %452 }
  0xa2   : > { %v448_v10 = vpop.permute.xlu0 %447 }
  0xa4   : > { %v463_v11 = vpop.permute.xlu1 %462 }
  0xa6   : > { %v458_v12 = vpop.permute.xlu0 %457 }
  0xa9   : > { %v473_v21 = vpop.permute.xlu1 %472 }
  0xaa   : > { %v468_v22 = vpop.permute.xlu0 %467 }
  0xad   : > { %v483_v39 = vpop.permute.xlu1 %482 }
  0xae   : > { %v478_v40 = vpop.permute.xlu0 %477 }
  0xfb   : > { %v703_v13 = vpop.f32.mrb[0].mxu0 }
  0xfc   : > { %v715_v14 = vpop.f32.mrb[0].mxu1  ;;  %v486_v15 = vmul.f32 %v703_v13, %v413_v4  ;;  %v310_v17 = vpop.f32.mrb[1].mxu0 }
  0xfd   : > { %v494_v16 = vmul.f32 %v715_v14, %v453_v9  ;;  %v350_v18 = vpop.f32.mrb[1].mxu1  ;;  %v485_v19 = vmul.f32 %v408_v2, %v310_v17 }
  0xfe   : > { %v493_v20 = vmul.f32 %v448_v10, %v350_v18  ;;  %502 = vst [vmem:[%s922_s6 + $0x8] sm:$0xff] %v486_v15 }
  0xff   : > { %510 = vst [vmem:[%s922_s6 + $0x48] sm:$0xff] %v494_v16  ;;  %501 = vst [vmem:[%s922_s6] sm:$0xff] %v485_v19  ;;  %v706_v23 = vpop.f32.mrb[2].mxu0 }
 0x100   : > { %509 = vst [vmem:[%s922_s6 + $0x40] sm:$0xff] %v493_v20  ;;  %v718_v24 = vpop.f32.mrb[2].mxu1  ;;  %v488_v25 = vmul.f32 %v706_v23, %v423_v3  ;;  %v320_v27 = vpop.f32.mrb[3].mxu0 }
 0x101   : > { %v496_v26 = vmul.f32 %v718_v24, %v463_v11  ;;  %v360_v28 = vpop.f32.mrb[3].mxu1  ;;  %v487_v29 = vmul.f32 %v418_v1, %v320_v27 }
 0x102   : > { %v495_v30 = vmul.f32 %v458_v12, %v360_v28  ;;  %504 = vst [vmem:[%s922_s6 + $0x18] sm:$0xff] %v488_v25 }
 0x103   : > { %512 = vst [vmem:[%s922_s6 + $0x58] sm:$0xff] %v496_v26  ;;  %503 = vst [vmem:[%s922_s6 + $0x10] sm:$0xff] %v487_v29  ;;  %v709_v31 = vpop.f32.mrb[4].mxu0 }
 0x104   : > { %511 = vst [vmem:[%s922_s6 + $0x50] sm:$0xff] %v495_v30  ;;  %v721_v32 = vpop.f32.mrb[4].mxu1  ;;  %v490_v33 = vmul.f32 %v709_v31, %v433_v5  ;;  %v330_v35 = vpop.f32.mrb[5].mxu0 }
 0x105   : > { %v498_v34 = vmul.f32 %v721_v32, %v473_v21  ;;  %v370_v36 = vpop.f32.mrb[5].mxu1  ;;  %v489_v37 = vmul.f32 %v428_v6, %v330_v35 }
 0x106   : > { %v497_v38 = vmul.f32 %v468_v22, %v370_v36  ;;  %506 = vst [vmem:[%s922_s6 + $0x28] sm:$0xff] %v490_v33 }
 0x107   : > { %514 = vst [vmem:[%s922_s6 + $0x68] sm:$0xff] %v498_v34  ;;  %505 = vst [vmem:[%s922_s6 + $0x20] sm:$0xff] %v489_v37  ;;  %v712_v41 = vpop.f32.mrb[6].mxu0 }
 0x108   : > { %513 = vst [vmem:[%s922_s6 + $0x60] sm:$0xff] %v497_v38  ;;  %v724_v42 = vpop.f32.mrb[6].mxu1  ;;  %v492_v43 = vmul.f32 %v712_v41, %v443_v7  ;;  %v340_v45 = vpop.f32.mrb[7].mxu0 }
 0x109   : > { %v500_v44 = vmul.f32 %v724_v42, %v483_v39  ;;  %v380_v46 = vpop.f32.mrb[7].mxu1  ;;  %v491_v47 = vmul.f32 %v438_v8, %v340_v45 }
 0x10a   : > { %v499_v48 = vmul.f32 %v478_v40, %v380_v46  ;;  %508 = vst [vmem:[%s922_s6 + $0x38] sm:$0xff] %v492_v43 }
 0x10b   : > { %516 = vst [vmem:[%s922_s6 + $0x78] sm:$0xff] %v500_v44  ;;  %507 = vst [vmem:[%s922_s6 + $0x30] sm:$0xff] %v491_v47 }
 0x10c   : > { %515 = vst [vmem:[%s922_s6 + $0x70] sm:$0xff] %v499_v48 }
 0x10d PF: > { %s13_s12 = sadd.s32 1, %s790_s12  }
 0x10e   : > { %p10_p4 = scmp.ge.s32.totalorder %s13_s12, 4  }
 0x110   :  { %12 = sbr.rel (!%p10_p4) target bundleno = 1 (0x1), region = 65 }

</bundles_post_ra>
